<compile_context>
chip_gen: v7x
topology: tpu7x:2x2x1
jax: 0.10.0
libtpu: 0.0.40
codegen_flags: <defaults>
</compile_context>

<pallas_src>
import jax
import jax.numpy as jnp
from jax import lax
from jax.experimental import pallas as pl
from jax.experimental.pallas import tpu as pltpu


# ------------------------------ Pallas kernel ------------------------------
def _shuffle_kernel(perm_ref, x_ref, o_ref):
    # perm_ref : (bt, 1) int32  -- output-token source indices for this block
    # x_ref    : (1, T, C)      -- all tokens of one batch element (VMEM resident)
    # o_ref    : (1, bt, C)
    perm = perm_ref[...]                                    # (bt, 1)
    bt = perm.shape[0]
    T = x_ref.shape[1]
    cols = lax.broadcasted_iota(jnp.int32, (bt, T), 1)      # (bt, T) column ids
    onehot = (cols == perm).astype(jnp.float32)             # P[i, j] = (j == perm[i])
    x = x_ref[0].astype(jnp.float32)                        # (T, C)
    # One MXU matmul == exact row gather: y[i] = x[perm[i]]
    y = jnp.dot(onehot, x, preferred_element_type=jnp.float32)
    o_ref[0] = y.astype(o_ref.dtype)


def _pick_token_block(T):
    # Biggest output-token block that divides T (keeps the (bt, T) one-hot
    # tile modest for large T while minimizing grid steps for small T).
    if T <= 512:
        return T
    for bt in (512, 256, 128, 64, 32, 16, 8):
        if T % bt == 0:
            return bt
    return T  # odd T: single full-extent block


def shuffle_tokens(x_tokens, perm):
    """x_tokens: (B, T, C); perm: (T,) int — returns x_tokens[:, perm, :]."""
    B, T, C = x_tokens.shape
    bt = _pick_token_block(T)
    grid = (B, T // bt)
    perm2 = perm.astype(jnp.int32).reshape(T, 1)

    # Rough VMEM estimate (double-buffered x block + out block + one-hot/acc);
    # raise the scoped limit only when the default would be tight.
    est = 2 * T * C * 4 + 2 * bt * C * 4 + bt * T * 4 + bt * C * 4
    cp_kwargs = dict(dimension_semantics=("parallel", "parallel"))
    if est > 24 * 1024 * 1024:
        cp_kwargs["vmem_limit_bytes"] = min(int(est * 2), 100 * 1024 * 1024)

    return pl.pallas_call(
        _shuffle_kernel,
        out_shape=jax.ShapeDtypeStruct((B, T, C), x_tokens.dtype),
        grid=grid,
        in_specs=[
            pl.BlockSpec((bt, 1), lambda b, t: (t, 0)),        # perm rows for block t
            pl.BlockSpec((1, T, C), lambda b, t: (b, 0, 0)),   # all tokens of batch b
        ],
        out_specs=pl.BlockSpec((1, bt, C), lambda b, t: (b, t, 0)),
        compiler_params=pltpu.CompilerParams(**cp_kwargs),
    )(perm2, x_tokens)


# ------------------------------ module forward ------------------------------
def shuffle_forward(x, perm=None, *, training=True):
    """Shuffle.forward: permute the H*W spatial tokens (training mode only)."""
    if not training or perm is None:
        return x                                   # eval mode: identity
    B, H, W, C = x.shape
    T = H * W
    xt = x.reshape(B, T, C)                        # free HBM reshape (row-major)
    out = shuffle_tokens(xt, perm)
    return out.reshape(B, H, W, C)
    # TODO(synk): torch.randperm uses torch's global CPU RNG; here the permutation
    # is supplied by the caller (jax.random.permutation), so the exact random
    # stream differs from PyTorch while the op semantics match.


# ----------------------------------- main -----------------------------------
if __name__ == "__main__":
    B, H, W, C = 2, 16, 16, 32                     # NHWC, as the module receives it
    key = jax.random.PRNGKey(0)
    kx, kp = jax.random.split(key)
    x = jax.random.normal(kx, (B, H, W, C), jnp.float32)
    perm = jax.random.permutation(kp, H * W)       # torch.randperm(H*W) equivalent

    fwd = jax.jit(lambda xx, rr: shuffle_forward(xx, rr, training=True))
    out = jax.block_until_ready(fwd(x, perm))

    # reference: x.reshape(B, -1, C)[:, r, :].reshape(B, H, W, -1)
    ref = x.reshape(B, H * W, C)[:, perm, :].reshape(B, H, W, C)
    assert out.shape == x.shape
    assert jnp.all(jnp.isfinite(out))
    assert jnp.allclose(out, ref, atol=1e-6, rtol=1e-6)

    # eval mode is the identity
    out_eval = shuffle_forward(x, perm, training=False)
    assert jnp.array_equal(out_eval, x)

    print("KERNEL_OK")
</pallas_src>

<mosaic_0001>
module attributes {stable_mosaic.version = 11 : i64} {
  func.func @_shuffle_kernel(%arg0: i32, %arg1: i32, %arg2: memref<256x1xi32, #tpu.memory_space<vmem>>, %arg3: memref<1x256x32xf32, #tpu.memory_space<vmem>>, %arg4: memref<1x256x32xf32, #tpu.memory_space<vmem>>) attributes {dimension_semantics = [#tpu.dimension_semantics<parallel>, #tpu.dimension_semantics<parallel>], iteration_bounds = array<i64: 2, 1>, scalar_prefetch = 0 : i64, scratch_operands = 0 : i64, tpu.core_type = #tpu.core_type<tc>, window_params = [{transform_indices = @transform_0, window_bounds = array<i64: 256, 1>}, {transform_indices = @transform_1, window_bounds = array<i64: 1, 256, 32>}, {transform_indices = @transform_2, window_bounds = array<i64: 1, 256, 32>}]} {
    %c0 = arith.constant 0 : index
    %c0_0 = arith.constant 0 : index
    %0 = vector.load %arg2[%c0, %c0_0] : memref<256x1xi32, #tpu.memory_space<vmem>>, vector<256x1xi32>
    %1 = tpu.iota {dimensions = array<i32: 1>} : vector<256x256xi32>
    %2 = vector.broadcast %0 : vector<256x1xi32> to vector<256x256xi32>
    %3 = arith.cmpi eq, %1, %2 : vector<256x256xi32>
    %4 = arith.extui %3 : vector<256x256xi1> to vector<256x256xi32>
    %5 = arith.sitofp %4 : vector<256x256xi32> to vector<256x256xf32>
    %c0_1 = arith.constant 0 : index
    %c0_2 = arith.constant 0 : index
    %c0_3 = arith.constant 0 : index
    %6 = vector.load %arg3[%c0_1, %c0_2, %c0_3] : memref<1x256x32xf32, #tpu.memory_space<vmem>>, vector<1x256x32xf32>
    %7 = vector.shape_cast %6 : vector<1x256x32xf32> to vector<256x32xf32>
    %cst = arith.constant dense<0.000000e+00> : vector<256x32xf32>
    %8 = tpu.matmul %5, %7, %cst {dimension_numbers = #tpu.dot_dimension_numbers<[1], [0], [0], [1], [0, 0, 1, 1], [], []>} : vector<256x256xf32>, vector<256x32xf32>, vector<256x32xf32> -> vector<256x32xf32>
    %c0_4 = arith.constant 0 : index
    %c0_5 = arith.constant 0 : index
    %c0_6 = arith.constant 0 : index
    %9 = vector.load %arg4[%c0_4, %c0_5, %c0_6] : memref<1x256x32xf32, #tpu.memory_space<vmem>>, vector<1x256x32xf32>
    %10 = vector.shape_cast %9 : vector<1x256x32xf32> to vector<256x32xf32>
    %11 = vector.shape_cast %8 : vector<256x32xf32> to vector<1x256x32xf32>
    tpu.vector_store %arg4[%c0_4, %c0_5, %c0_6], %11 {strides = array<i32>} : memref<1x256x32xf32, #tpu.memory_space<vmem>>, vector<1x256x32xf32>,
    return
  }
  func.func @transform_0(%arg0: i32, %arg1: i32) -> (i32, i32) {
    %c0_i32 = arith.constant 0 : i32
    %c0_i32_0 = arith.constant 0 : i32
    return %arg1, %c0_i32 : i32, i32
  }
  func.func @transform_1(%arg0: i32, %arg1: i32) -> (i32, i32, i32) {
    %c0_i32 = arith.constant 0 : i32
    %c0_i32_0 = arith.constant 0 : i32
    %c0_i32_1 = arith.constant 0 : i32
    return %arg0, %c0_i32, %c0_i32_0 : i32, i32, i32
  }
  func.func @transform_2(%arg0: i32, %arg1: i32) -> (i32, i32, i32) {
    %c0_i32 = arith.constant 0 : i32
    %c0_i32_0 = arith.constant 0 : i32
    return %arg0, %arg1, %c0_i32 : i32, i32, i32
  }
}

</mosaic_0001>

<bundles_post_ra>
// kernel: _lambda_.1
= control target key start
LH: loop header
LB: loop body
LE: loop exit
PB: predicated region body
PF: predicated region fallthrough
CT: control target
= control target key end

     0   :  { %7 = vsyncpa [#allocation3], 0  ;;  %s1903_s0 = inlined_call_operand.vmem [shape: s32[256,1], index: 0, kind: input, shape index: {}]   ;;  %s1904_s1 = inlined_call_operand.hbm [shape: f32[2,256,32], index: 1, kind: input, shape index: {}]   ;;  %s1905_s2 = inlined_call_operand.hbm [shape: f32[2,256,32], index: 2, kind: output, shape index: {}]  }
   0x1   :  { %9 = vsyncpa [#allocation3 + $0x1], 0 }
   0x2   :  { %10 = vsyncpa [#allocation4], 0 }
   0x3   :  { %12 = vsyncpa [#allocation4 + $0x1], 0  ;;  %s1362_s9 = smov 0   ;;  %s1364_s10 = smov 0  }
   0x4   :  { %s1366_s11 = smov 0   ;;  %s1368_s12 = smov 0  }
   0x5   :  { %s1370_s13 = smov 0   ;;  %s1372_s14 = smov 0  }
   0x6 LB: > { %s927_s15 = sadd.s32 4294967295, %s1336_s14   ;;  %s928_s16 = sadd.s32 4294967294, %s1336_s14   ;;  %s1336_s14 = sphi %s1372_s14, %s18_s14   ;;  %s1332_s13 = sphi %s1370_s13, %s1920_s13   ;;  %s1328_s12 = sphi %s1368_s12, %s1919_s12   ;;  %s1324_s11 = sphi %s1366_s11, %s1918_s11   ;;  %s1320_s10 = sphi %s1364_s10, %s1917_s10   ;;  %s1316_s9 = sphi %s1362_s9, %s1916_s9  }
   0x7   : > { %s30_s17 = sadd.s32 1, %s1332_s13  ;;  %s63_s18 = sadd.s32 1, %s1324_s11 }
   0x8   : > { %p32_p0 = scmp.ge.s32.totalorder %s30_s17, 2  ;;  %p70_p1 = scmp.ne.s32.totalorder %s1324_s11, %s1320_s10 }
   0x9   : > { %p71_p2 = scmp.eq.s32.totalorder %s1336_s14, 0  ;;  %p76_p3 = scmp.ne.s32.totalorder %s1320_s10, %s1316_s9 }
   0xa   : > { %s1922_s17 = smov (%p32_p0, %s30_s17), 0  ;;  %p77_p5 = scmp.eq.s32.totalorder %s927_s15, 0 }
   0xb   : > { %p1403_p4 = por %p71_p2, %p70_p1  ;;  %s60_s20 = ssub.s32 %s1332_s13, %s1922_s17 }
   0xc   : > { %p102_p6 = scmp.eq.s32.totalorder %s927_s15, 1  ;;  %p61_p7 = scmp.eq.s32.totalorder %s60_s20, 0 }
   0xd   : > { %p1409_p8 = por %p77_p5, %p76_p3  ;;  %p108_p10 = scmp.eq.s32.totalorder %s928_s16, 1 }
   0xe   : > { %p1413_p9 = por %p102_p6, %p70_p1  ;;  %p1165_p13 = scmp.lt.s32.totalorder %s1336_s14, 2 }
   0xf   : > { %s1418_s23 = scalar_select %p61_p7, %s1324_s11, %s63_s18  }
  0x10   : > { %s1909_s22 = scalar_select %p1413_p9, 1, 0 }
  0x11   : > { %p1420_p11 = por %p108_p10, %p76_p3  ;;  %s137_s25 = sand.u32 1, %s1324_s11  }
  0x12   : > { %s932_s26 = sshll.u32 %s137_s25, 8  ;;  %s1071_s27 = sshll.u32 %s1332_s13, 12 }
  0x13   : > { %s1910_s24 = scalar_select %p1420_p11, 1, 0 }
  0x14   : > { %s1431_s30 = scalar_lea.hbm %s1904_s1, %s1071_s27  ;;  %s141_s3 = scalar_lea.vmem [#allocation2], %s932_s26 }
  0x15   : > { %s148_s4 = sshll.u32 %s141_s3, 4  ;;  %p1437_p0 = pnand %p1165_p13, %p1403_p4  ;;  %s1433_s4 = int_to_ptr.vmem [resolvable:$true] %s148_s4 }
  0x16   : > { %s1442_s6 = scalar_lea.sflag [#allocation3], %s137_s25  ;;  %s1224_s7 = scalar_lea.hbm %s1431_s30, 4096 }
  0x17   : > { %p1225_p2 = scmp.ne.s32.totalorder %s1431_s30, %s1224_s7  ;;  %p1226_p3 = pneg %p1437_p0 }
  0x18   : > { %s1229_s16 = scalar_lea.hbm %s1904_s1, 8192  ;;  %p1230_p4 = scmp.lt.u32.totalorder %s1431_s30, %s1904_s1 }
  0x19   : > { %p1227_p5 = pnand %p1226_p3, %p1225_p2  ;;  %p1231_p7 = scmp.lt.u32.totalorder %s1229_s16, %s1224_s7 }
  0x1a   : > { %p1233_p13 = scmp.lt.u32.totalorder %s1224_s7, %s1431_s30 }
  0x1b   : > { %p1228_p6 = pneg %p1227_p5  ;;  %p1232_p10 = por %p1231_p7, %p1230_p4 }
  0x1d   : > { %p1234_p12 = por %p1233_p13, %p1232_p10 }
  0x1f   : > { %p1235_p1 = pnand %p1234_p12, %p1228_p6 }
  0x21   : > { %1238 = shalt.err (!%p1235_p1)
}
  0x22   : > { %s1239_s20 = scalar_lea.vmem %s1433_s4, 4096  ;;  %s1338_s25 = smov [#allocation2]  }
  0x23   : > { %p1240_p2 = scmp.ne.s32.totalorder %s1433_s4, %s1239_s20  ;;  %s1244_s26 = sshll.u32 %s1338_s25, 4  ;;  %s1245_s26 = int_to_ptr.vmem [resolvable:$false] %s1244_s26 }
  0x24   : > { %s1246_s27 = scalar_lea.vmem %s1245_s26, 8192  ;;  %p1247_p9 = scmp.lt.s32.totalorder %s1433_s4, %s1245_s26 }
  0x25   : > { %p1242_p5 = pnand %p1240_p2, %p1226_p3  ;;  %p1248_p4 = scmp.lt.s32.totalorder %s1246_s27, %s1239_s20 }
  0x27   : > { %p1243_p11 = pneg %p1242_p5  ;;  %p1249_p7 = por %p1248_p4, %p1247_p9 }
  0x29   : > { %p1250_p10 = pnand %p1249_p7, %p1243_p11 }
  0x2b   : > { %1253 = shalt.err (!%p1250_p10)
}
  0x2c   : > { %s1339_s28 = smov 128   ;;  %s1340_s29 = smov 8  }
  0x2d   : > { %1160 = dma.hbm_to_vmem [thread:$0]  (!%p1437_p0), %s1431_s30, 4096, %s1433_s4, %s1442_s6, %s1339_s28, %s1339_s28, %s1340_s29  }
  0x2e   : > { %p156_p12 = scmp.lt.s32.totalorder %s1336_s14, 3  ;;  %p1912_p1 = scmp.ge.s32.totalorder %s1336_s14, 1 }
  0x30   : > { %p157_p3 = pnand %p1912_p1, %p156_p12 }
  0x31   : > { %s1474_s3 = sand.u32 (!%p157_p3), 1, %s1320_s10  }
  0x32   : > { %160 = sbr.rel (%p157_p3) target bundleno = 482 (0x1e2), region = 28  ;;  %s936_s7 = sshll.u32 (!%p157_p3), %s1474_s3, 8 }
  0x33   : > { %s163_s8 = scalar_lea.sflag (!%p157_p3), [#allocation3], %s1474_s3  ;;  %s1480_s15 = scalar_lea.vmem (!%p157_p3), [#allocation2], %s936_s7 }
  0x39   : > { %1307 = dma.done.wait (%p1409_p8), %s163_s8, 4096  }
  0x3a   : > { %1309 = vsyncadd (%p1409_p8), %s163_s8, 4294963200  ;;  %v1341_v0 = vmov 0   ;;  %v1342_v1 = vmov 0.0|0.0   ;;  %v200_v2 = vld [vmem:[%s1903_s0 + $0x8] sm:$0xff]  ;;  %v199_v3 = vld [vmem:[%s1903_s0] sm:$0xff]  ;;  %p1913_p9 = scmp.ne.s32.totalorder %s1909_s22, 0 }
  0x3b   : > { %1223 = vset.pattern.permute.xlu1 %v1341_v0  ;;  %1222 = vset.pattern.permute.xlu0 %v1341_v0  ;;  %v216_v4 = vld [vmem:[%s1903_s0 + $0x88] sm:$0xff]  ;;  %v215_v5 = vld [vmem:[%s1903_s0 + $0x80] sm:$0xff]  ;;  %v217_v6 = vld [vmem:[%s1903_s0 + $0x90] sm:$0xff]  ;;  %s1344_s25 = smov [#allocation5]  }
  0x3c   : > { %1073 = vmatprep.subr.bf16.mxu0 %v1342_v1  ;;  %1121 = vmatprep.subr.bf16.mxu1 %v1342_v1  ;;  %v201_v7 = vld [vmem:[%s1903_s0 + $0x10] sm:$0xff]  ;;  %v218_v8 = vld [vmem:[%s1903_s0 + $0x98] sm:$0xff]  ;;  %v522_v10 = vld [vmem:[%s1480_s15] sm:$0xff]  ;;  %s1258_s26 = sshll.u32 %s1344_s25, 4  ;;  %s1259_s26 = int_to_ptr.vmem [resolvable:$false] %s1258_s26 }
  0x3d   : > { %238 = vperm.xlu1 %1223, %v200_v2   ;;  %235 = vperm.xlu0 %1222, %v199_v3   ;;  %v202_v9 = vld [vmem:[%s1903_s0 + $0x18] sm:$0xff]  ;;  %v523_v11 = vld [vmem:[%s1480_s15 + $0x8] sm:$0xff]  ;;  %v524_v12 = vld [vmem:[%s1480_s15 + $0x10] sm:$0xff]  ;;  %s1260_s27 = scalar_lea.vmem %s1259_s26, 8192 }
  0x3e   : > { %v525_v13 = vld [vmem:[%s1480_s15 + $0x18] sm:$0xff]  ;;  %v1074_v14 = vpack.c.bf16 %v523_v11, %v522_v10  ;;  %v219_v15 = vld [vmem:[%s1903_s0 + $0xa0] sm:$0xff]  ;;  %v527_v19 = vld [vmem:[%s1480_s15 + $0x28] sm:$0xff] }
  0x3f   : > { %v203_v16 = vld [vmem:[%s1903_s0 + $0x20] sm:$0xff]  ;;  %v1077_v17 = vpack.c.bf16 %v525_v13, %v524_v12  ;;  %v220_v20 = vld [vmem:[%s1903_s0 + $0xa8] sm:$0xff]  ;;  %v528_v23 = vld [vmem:[%s1480_s15 + $0x30] sm:$0xff] }
  0x40   : > { %1075 = vmatpush1.bf16.msra.mxu0 %v1074_v14  ;;  %1137 = vmatpush1.bf16.msra.mxu1 %v1074_v14  ;;  %v526_v18 = vld [vmem:[%s1480_s15 + $0x20] sm:$0xff]  ;;  %v204_v21 = vld [vmem:[%s1903_s0 + $0x28] sm:$0xff]  ;;  %v529_v24 = vld [vmem:[%s1480_s15 + $0x38] sm:$0xff] }
  0x41   : > { %286 = vperm.xlu1 %1223, %v216_v4   ;;  %283 = vperm.xlu0 %1222, %v215_v5   ;;  %v1080_v22 = vpack.c.bf16 %v527_v19, %v526_v18  ;;  %v221_v25 = vld [vmem:[%s1903_s0 + $0xb0] sm:$0xff]  ;;  %v1083_v27 = vpack.c.bf16 %v529_v24, %v528_v23  ;;  %v530_v28 = vld [vmem:[%s1480_s15 + $0x40] sm:$0xff]  ;;  %v531_v29 = vld [vmem:[%s1480_s15 + $0x48] sm:$0xff]  ;;  %v231_v19 = vlaneseq  ;;  %v1343_v24 = vmov 1.0  }
  0x42   : > { %1076 = vmatprep.subr.bf16.mxu0 %v1342_v1  ;;  %1122 = vmatprep.subr.bf16.mxu1 %v1342_v1  ;;  %v205_v26 = vld [vmem:[%s1903_s0 + $0x30] sm:$0xff]  ;;  %v222_v30 = vld [vmem:[%s1903_s0 + $0xb8] sm:$0xff]  ;;  %v1086_v32 = vpack.c.bf16 %v531_v29, %v530_v28  ;;  %v223_v35 = vld [vmem:[%s1903_s0 + $0xc0] sm:$0xff] }
  0x43   : > { %v206_v31 = vld [vmem:[%s1903_s0 + $0x38] sm:$0xff]  ;;  %v532_v33 = vld [vmem:[%s1480_s15 + $0x50] sm:$0xff]  ;;  %v207_v36 = vld [vmem:[%s1903_s0 + $0x40] sm:$0xff] }
  0x44   : > { %1078 = vmatpush1.bf16.msra.mxu0 %v1077_v17  ;;  %1138 = vmatpush1.bf16.msra.mxu1 %v1077_v17  ;;  %v533_v34 = vld [vmem:[%s1480_s15 + $0x58] sm:$0xff]  ;;  %v534_v38 = vld [vmem:[%s1480_s15 + $0x60] sm:$0xff]  ;;  %v535_v39 = vld [vmem:[%s1480_s15 + $0x68] sm:$0xff] }
  0x45   : > { %289 = vperm.xlu1 %1223, %v217_v6   ;;  %241 = vperm.xlu0 %1222, %v201_v7   ;;  %v1089_v37 = vpack.c.bf16 %v533_v34, %v532_v33  ;;  %v224_v40 = vld [vmem:[%s1903_s0 + $0xc8] sm:$0xff]  ;;  %v1092_v42 = vpack.c.bf16 %v535_v39, %v534_v38  ;;  %v536_v43 = vld [vmem:[%s1480_s15 + $0x70] sm:$0xff]  ;;  %v537_v44 = vld [vmem:[%s1480_s15 + $0x78] sm:$0xff] }
  0x46   : > { %1079 = vmatprep.subr.bf16.mxu0 %v1342_v1  ;;  %1123 = vmatprep.subr.bf16.mxu1 %v1342_v1  ;;  %v208_v41 = vld [vmem:[%s1903_s0 + $0x48] sm:$0xff]  ;;  %v225_v45 = vld [vmem:[%s1903_s0 + $0xd0] sm:$0xff]  ;;  %v1095_v47 = vpack.c.bf16 %v537_v44, %v536_v43  ;;  %v538_v48 = vld [vmem:[%s1480_s15 + $0x80] sm:$0xff] }
  0x47   : > { %v209_v46 = vld [vmem:[%s1903_s0 + $0x50] sm:$0xff]  ;;  %v539_v49 = vld [vmem:[%s1480_s15 + $0x88] sm:$0xff]  ;;  %v226_v50 = vld [vmem:[%s1903_s0 + $0xd8] sm:$0xff] }
  0x48   : > { %1081 = vmatpush1.bf16.msra.mxu0 %v1080_v22  ;;  %1139 = vmatpush1.bf16.msra.mxu1 %v1080_v22  ;;  %v210_v51 = vld [vmem:[%s1903_s0 + $0x58] sm:$0xff]  ;;  %v1098_v52 = vpack.c.bf16 %v539_v49, %v538_v48  ;;  %v540_v53 = vld [vmem:[%s1480_s15 + $0x90] sm:$0xff]  ;;  %v227_v55 = vld [vmem:[%s1903_s0 + $0xe0] sm:$0xff] }
  0x49   : > { %292 = vperm.xlu1 %1223, %v218_v8   ;;  %244 = vperm.xlu0 %1222, %v202_v9   ;;  %v541_v54 = vld [vmem:[%s1480_s15 + $0x98] sm:$0xff]  ;;  %v211_v56 = vld [vmem:[%s1903_s0 + $0x60] sm:$0xff]  ;;  %v543_v59 = vld [vmem:[%s1480_s15 + $0xa8] sm:$0xff] }
  0x4a   : > { %1082 = vmatprep.subr.bf16.mxu0 %v1342_v1  ;;  %1124 = vmatprep.subr.bf16.mxu1 %v1342_v1  ;;  %v1101_v57 = vpack.c.bf16 %v541_v54, %v540_v53  ;;  %v542_v58 = vld [vmem:[%s1480_s15 + $0xa0] sm:$0xff]  ;;  %v228_v60 = vld [vmem:[%s1903_s0 + $0xe8] sm:$0xff]  ;;  %v544_v63 = vld [vmem:[%s1480_s15 + $0xb0] sm:$0xff] }
  0x4b   : > { %v212_v61 = vld [vmem:[%s1903_s0 + $0x68] sm:$0xff]  ;;  %v1104_v62 = vpack.c.bf16 %v543_v59, %v542_v58  ;;  %v545_v0 = vld [vmem:[%s1480_s15 + $0xb8] sm:$0xff]  ;;  %v229_v2 = vld [vmem:[%s1903_s0 + $0xf0] sm:$0xff] }
  0x4c   : > { %1084 = vmatpush1.bf16.msra.mxu0 %v1083_v27  ;;  %1140 = vmatpush1.bf16.msra.mxu1 %v1083_v27  ;;  %v213_v3 = vld [vmem:[%s1903_s0 + $0x70] sm:$0xff]  ;;  %v1107_v4 = vpack.c.bf16 %v545_v0, %v544_v63  ;;  %v546_v5 = vld [vmem:[%s1480_s15 + $0xc0] sm:$0xff]  ;;  %v547_v6 = vld [vmem:[%s1480_s15 + $0xc8] sm:$0xff] }
  0x4d   : > { %295 = vperm.xlu1 %1223, %v219_v15   ;;  %247 = vperm.xlu0 %1222, %v203_v16   ;;  %v230_v7 = vld [vmem:[%s1903_s0 + $0xf8] sm:$0xff]  ;;  %v1110_v9 = vpack.c.bf16 %v547_v6, %v546_v5  ;;  %v548_v10 = vld [vmem:[%s1480_s15 + $0xd0] sm:$0xff]  ;;  %v550_v13 = vld [vmem:[%s1480_s15 + $0xe0] sm:$0xff] }
  0x4e   : > { %1085 = vmatprep.subr.bf16.mxu0 %v1342_v1  ;;  %1125 = vmatprep.subr.bf16.mxu1 %v1342_v1  ;;  %v214_v8 = vld [vmem:[%s1903_s0 + $0x78] sm:$0xff]  ;;  %v551_v14 = vld [vmem:[%s1480_s15 + $0xe8] sm:$0xff]  ;;  %v552_v16 = vld [vmem:[%s1480_s15 + $0xf0] sm:$0xff] }
  0x4f   : > { %v549_v11 = vld [vmem:[%s1480_s15 + $0xd8] sm:$0xff]  ;;  %v1116_v15 = vpack.c.bf16 %v551_v14, %v550_v13 }
  0x50   : > { %1087 = vmatpush1.bf16.msra.mxu0 %v1086_v32  ;;  %1141 = vmatpush1.bf16.msra.mxu1 %v1086_v32  ;;  %v1113_v12 = vpack.c.bf16 %v549_v11, %v548_v10  ;;  %v553_v17 = vld [vmem:[%s1480_s15 + $0xf8] sm:$0xff]  ;;  %s1781_s15 = scalar_lea.vmem [#allocation5], %s936_s7  ;;  %s1072_s7 = sshll.u32 %s1328_s12, 12 }
  0x51   : > { %298 = vperm.xlu1 %1223, %v220_v20   ;;  %250 = vperm.xlu0 %1222, %v204_v21   ;;  %v1119_v18 = vpack.c.bf16 %v553_v17, %v552_v16  ;;  %v1646_v20 = vand.u32 127, %v231_v19  ;;  %s828_s21 = sshll.u32 %s1781_s15, 4  ;;  %s1850_s19 = scalar_lea.hbm %s1905_s2, %s1072_s7  ;;  %s1852_s21 = int_to_ptr.vmem [resolvable:$true] %s828_s21 }
  0x52   : > { %1088 = vmatprep.subr.bf16.mxu0 %v1342_v1  ;;  %1126 = vmatprep.subr.bf16.mxu1 %v1342_v1  ;;  %s813_s12 = scalar_lea.sflag [#allocation4], %s1474_s3  ;;  %s1254_s20 = scalar_lea.vmem %s1852_s21, 4096 }
  0x53   : > { %v1649_v21 = vadd.s32 128, %v1646_v20  ;;  %p1255_p8 = scmp.ne.s32.totalorder %s1852_s21, %s1254_s20  ;;  %p1261_p6 = scmp.lt.s32.totalorder %s1852_s21, %s1259_s26 }
  0x54   : > { %1090 = vmatpush1.bf16.msra.mxu0 %v1089_v37  ;;  %1142 = vmatpush1.bf16.msra.mxu1 %v1089_v37  ;;  %p1262_p13 = scmp.lt.s32.totalorder %s1260_s27, %s1254_s20 }
  0x55   : > { %301 = vperm.xlu1 %1223, %v221_v25   ;;  %253 = vperm.xlu0 %1222, %v205_v26   ;;  %p1256_p11 = pnand %p1255_p8, %p1913_p9 }
  0x56   : > { %1091 = vmatprep.subr.bf16.mxu0 %v1342_v1  ;;  %1127 = vmatprep.subr.bf16.mxu1 %v1342_v1  ;;  %p1263_p2 = por %p1262_p13, %p1261_p6 }
  0x57   : > { %p1257_p0 = pneg %p1256_p11 }
  0x58   : > { %1093 = vmatpush1.bf16.msra.mxu0 %v1092_v42  ;;  %1143 = vmatpush1.bf16.msra.mxu1 %v1092_v42 }
  0x59   : > { %304 = vperm.xlu1 %1223, %v222_v30   ;;  %256 = vperm.xlu0 %1222, %v206_v31   ;;  %p1264_p5 = pnand %p1263_p2, %p1257_p0 }
  0x5a   : > { %1094 = vmatprep.subr.bf16.mxu0 %v1342_v1  ;;  %1128 = vmatprep.subr.bf16.mxu1 %v1342_v1 }
  0x5c   : > { %1096 = vmatpush1.bf16.msra.mxu0 %v1095_v47  ;;  %1144 = vmatpush1.bf16.msra.mxu1 %v1095_v47 }
  0x5d   : > { %307 = vperm.xlu1 %1223, %v223_v35   ;;  %259 = vperm.xlu0 %1222, %v207_v36  }
  0x5e   : > { %1097 = vmatprep.subr.bf16.mxu0 %v1342_v1  ;;  %1129 = vmatprep.subr.bf16.mxu1 %v1342_v1 }
  0x60   : > { %1099 = vmatpush1.bf16.msra.mxu0 %v1098_v52  ;;  %1145 = vmatpush1.bf16.msra.mxu1 %v1098_v52 }
  0x61   : > { %310 = vperm.xlu1 %1223, %v224_v40   ;;  %262 = vperm.xlu0 %1222, %v208_v41  }
  0x62   : > { %1100 = vmatprep.subr.bf16.mxu0 %v1342_v1  ;;  %1130 = vmatprep.subr.bf16.mxu1 %v1342_v1 }
  0x64   : > { %1102 = vmatpush1.bf16.msra.mxu0 %v1101_v57  ;;  %1146 = vmatpush1.bf16.msra.mxu1 %v1101_v57 }
  0x65   : > { %313 = vperm.xlu1 %1223, %v225_v45   ;;  %265 = vperm.xlu0 %1222, %v209_v46  }
  0x66   : > { %1103 = vmatprep.subr.bf16.mxu0 %v1342_v1  ;;  %1131 = vmatprep.subr.bf16.mxu1 %v1342_v1 }
  0x68   : > { %1105 = vmatpush1.bf16.msra.mxu0 %v1104_v62  ;;  %1147 = vmatpush1.bf16.msra.mxu1 %v1104_v62 }
  0x69   : > { %316 = vperm.xlu1 %1223, %v226_v50   ;;  %268 = vperm.xlu0 %1222, %v210_v51  }
  0x6a   : > { %1106 = vmatprep.subr.bf16.mxu0 %v1342_v1  ;;  %1132 = vmatprep.subr.bf16.mxu1 %v1342_v1 }
  0x6c   : > { %1108 = vmatpush1.bf16.msra.mxu0 %v1107_v4  ;;  %1148 = vmatpush1.bf16.msra.mxu1 %v1107_v4 }
  0x6d   : > { %319 = vperm.xlu1 %1223, %v227_v55   ;;  %271 = vperm.xlu0 %1222, %v211_v56  }
  0x6e   : > { %1109 = vmatprep.subr.bf16.mxu0 %v1342_v1  ;;  %1133 = vmatprep.subr.bf16.mxu1 %v1342_v1 }
  0x70   : > { %1111 = vmatpush1.bf16.msra.mxu0 %v1110_v9  ;;  %1149 = vmatpush1.bf16.msra.mxu1 %v1110_v9 }
  0x71   : > { %322 = vperm.xlu1 %1223, %v228_v60   ;;  %274 = vperm.xlu0 %1222, %v212_v61  }
  0x72   : > { %1112 = vmatprep.subr.bf16.mxu0 %v1342_v1  ;;  %1134 = vmatprep.subr.bf16.mxu1 %v1342_v1 }
  0x74   : > { %1114 = vmatpush1.bf16.msra.mxu0 %v1113_v12  ;;  %1150 = vmatpush1.bf16.msra.mxu1 %v1113_v12 }
  0x75   : > { %325 = vperm.xlu1 %1223, %v229_v2   ;;  %277 = vperm.xlu0 %1222, %v213_v3  }
  0x76   : > { %1115 = vmatprep.subr.bf16.mxu0 %v1342_v1  ;;  %1135 = vmatprep.subr.bf16.mxu1 %v1342_v1 }
  0x78   : > { %1117 = vmatpush1.bf16.msra.mxu0 %v1116_v15  ;;  %1151 = vmatpush1.bf16.msra.mxu1 %v1116_v15 }
  0x79   : > { %328 = vperm.xlu1 %1223, %v230_v7   ;;  %280 = vperm.xlu0 %1222, %v214_v8  }
  0x7a   : > { %1118 = vmatprep.subr.bf16.mxu0 %v1342_v1  ;;  %1136 = vmatprep.subr.bf16.mxu1 %v1342_v1 }
  0x7c   : > { %1120 = vmatpush1.bf16.msra.mxu0 %v1119_v18  ;;  %1152 = vmatpush1.bf16.msra.mxu1 %v1119_v18 }
  0xbc   : > { %v239_v22 = vpop.permute.xlu1 %238  ;;  %v236_v23 = vpop.permute.xlu0 %235 }
  0xbd   : > { %vm333_vm0 = vcmp.eq.s32.totalorder %v1649_v21, %v239_v22  ;;  %vm330_vm1 = vcmp.eq.s32.totalorder %v1646_v20, %v236_v23  ;;  %vm331_vm2 = vcmp.eq.s32.totalorder %v1649_v21, %v236_v23  ;;  %vm332_vm3 = vcmp.eq.s32.totalorder %v1646_v20, %v239_v22 }
  0xbe   : > { %1002 = vmatprep.mubr.msk.f32.mxu0 %vm331_vm2, %v1343_v24 }
  0xbf   : > { %1003 = vmatmul.mubr.msk.f32.vlgmr.msra.gmra.mrb[0].mxu0 %vm330_vm1, %v1343_v24 }
  0xc0   : > { %v287_v1 = vpop.permute.xlu1 %286  ;;  %v284_v25 = vpop.permute.xlu0 %283  ;;  %1004 = vmatprep.mubr.msk.f32.mxu0 %vm333_vm0, %v1343_v24 }
  0xc1   : > { %vm362_vm4 = vcmp.eq.s32.totalorder %v1646_v20, %v284_v25  ;;  %vm363_vm5 = vcmp.eq.s32.totalorder %v1649_v21, %v284_v25  ;;  %vm365_vm6 = vcmp.eq.s32.totalorder %v1649_v21, %v287_v1  ;;  %vm364_vm9 = vcmp.eq.s32.totalorder %v1646_v20, %v287_v1 }
  0xc2   : > { %1034 = vmatprep.mubr.msk.f32.mxu1 %vm363_vm5, %v1343_v24 }
  0xc3   : > { %1005 = vmatmul.mubr.msk.f32.gmra.mrb[2].mxu0 %vm332_vm3, %v1343_v24  ;;  %1035 = vmatmul.mubr.msk.f32.vlgmr.msra.gmra.mrb[0].mxu1 %vm362_vm4, %v1343_v24 }
  0xc4   : > { %v290_v26 = vpop.permute.xlu1 %289  ;;  %1036 = vmatprep.mubr.msk.f32.mxu1 %vm365_vm6, %v1343_v24  ;;  %v242_v27 = vpop.permute.xlu0 %241 }
  0xc5   : > { %vm334_vm7 = vcmp.eq.s32.totalorder %v1646_v20, %v242_v27  ;;  %vm335_vm8 = vcmp.eq.s32.totalorder %v1649_v21, %v242_v27  ;;  %vm367_vm10 = vcmp.eq.s32.totalorder %v1649_v21, %v290_v26  ;;  %vm366_vm13 = vcmp.eq.s32.totalorder %v1646_v20, %v290_v26 }
  0xc6   : > { %1006 = vmatprep.mubr.msk.f32.mxu0 %vm335_vm8, %v1343_v24 }
  0xc7   : > { %1007 = vmatmul.mubr.msk.f32.gmra.mrb[4].mxu0 %vm334_vm7, %v1343_v24  ;;  %1037 = vmatmul.mubr.msk.f32.gmra.mrb[2].mxu1 %vm364_vm9, %v1343_v24 }
  0xc8   : > { %v293_v28 = vpop.permute.xlu1 %292  ;;  %1038 = vmatprep.mubr.msk.f32.mxu1 %vm367_vm10, %v1343_v24  ;;  %v245_v29 = vpop.permute.xlu0 %244 }
  0xc9   : > { %vm336_vm11 = vcmp.eq.s32.totalorder %v1646_v20, %v245_v29  ;;  %vm337_vm12 = vcmp.eq.s32.totalorder %v1649_v21, %v245_v29  ;;  %vm369_vm14 = vcmp.eq.s32.totalorder %v1649_v21, %v293_v28  ;;  %vm368_vm1 = vcmp.eq.s32.totalorder %v1646_v20, %v293_v28 }
  0xca   : > { %1008 = vmatprep.mubr.msk.f32.mxu0 %vm337_vm12, %v1343_v24 }
  0xcb   : > { %1009 = vmatmul.mubr.msk.f32.gmra.mrb[6].mxu0 %vm336_vm11, %v1343_v24  ;;  %1039 = vmatmul.mubr.msk.f32.gmra.mrb[4].mxu1 %vm366_vm13, %v1343_v24 }
  0xcc   : > { %v296_v30 = vpop.permute.xlu1 %295  ;;  %1040 = vmatprep.mubr.msk.f32.mxu1 %vm369_vm14, %v1343_v24  ;;  %v248_v31 = vpop.permute.xlu0 %247 }
  0xcd   : > { %vm338_vm15 = vcmp.eq.s32.totalorder %v1646_v20, %v248_v31  ;;  %vm339_vm0 = vcmp.eq.s32.totalorder %v1649_v21, %v248_v31  ;;  %vm371_vm2 = vcmp.eq.s32.totalorder %v1649_v21, %v296_v30  ;;  %vm370_vm5 = vcmp.eq.s32.totalorder %v1646_v20, %v296_v30 }
  0xce   : > { %1010 = vmatprep.mubr.msk.f32.mxu0 %vm339_vm0, %v1343_v24 }
  0xcf   : > { %1011 = vmatmul.mubr.msk.f32.gmra.mrb[8].mxu0 %vm338_vm15, %v1343_v24  ;;  %1041 = vmatmul.mubr.msk.f32.gmra.mrb[6].mxu1 %vm368_vm1, %v1343_v24 }
  0xd0   : > { %v299_v32 = vpop.permute.xlu1 %298  ;;  %1042 = vmatprep.mubr.msk.f32.mxu1 %vm371_vm2, %v1343_v24  ;;  %v251_v33 = vpop.permute.xlu0 %250 }
  0xd1   : > { %vm340_vm3 = vcmp.eq.s32.totalorder %v1646_v20, %v251_v33  ;;  %vm341_vm4 = vcmp.eq.s32.totalorder %v1649_v21, %v251_v33  ;;  %vm373_vm6 = vcmp.eq.s32.totalorder %v1649_v21, %v299_v32  ;;  %vm372_vm9 = vcmp.eq.s32.totalorder %v1646_v20, %v299_v32 }
  0xd2   : > { %1012 = vmatprep.mubr.msk.f32.mxu0 %vm341_vm4, %v1343_v24 }
  0xd3   : > { %1013 = vmatmul.mubr.msk.f32.gmra.mrb[10].mxu0 %vm340_vm3, %v1343_v24  ;;  %1043 = vmatmul.mubr.msk.f32.gmra.mrb[8].mxu1 %vm370_vm5, %v1343_v24 }
  0xd4   : > { %v302_v34 = vpop.permute.xlu1 %301  ;;  %1044 = vmatprep.mubr.msk.f32.mxu1 %vm373_vm6, %v1343_v24  ;;  %v254_v35 = vpop.permute.xlu0 %253 }
  0xd5   : > { %vm342_vm7 = vcmp.eq.s32.totalorder %v1646_v20, %v254_v35  ;;  %vm343_vm8 = vcmp.eq.s32.totalorder %v1649_v21, %v254_v35  ;;  %vm375_vm10 = vcmp.eq.s32.totalorder %v1649_v21, %v302_v34  ;;  %vm374_vm13 = vcmp.eq.s32.totalorder %v1646_v20, %v302_v34 }
  0xd6   : > { %1014 = vmatprep.mubr.msk.f32.mxu0 %vm343_vm8, %v1343_v24 }
  0xd7   : > { %1015 = vmatmul.mubr.msk.f32.gmra.mrb[12].mxu0 %vm342_vm7, %v1343_v24  ;;  %1045 = vmatmul.mubr.msk.f32.gmra.mrb[10].mxu1 %vm372_vm9, %v1343_v24 }
  0xd8   : > { %v305_v36 = vpop.permute.xlu1 %304  ;;  %1046 = vmatprep.mubr.msk.f32.mxu1 %vm375_vm10, %v1343_v24  ;;  %v257_v37 = vpop.permute.xlu0 %256 }
  0xd9   : > { %vm344_vm11 = vcmp.eq.s32.totalorder %v1646_v20, %v257_v37  ;;  %vm345_vm12 = vcmp.eq.s32.totalorder %v1649_v21, %v257_v37  ;;  %vm377_vm14 = vcmp.eq.s32.totalorder %v1649_v21, %v305_v36  ;;  %vm376_vm1 = vcmp.eq.s32.totalorder %v1646_v20, %v305_v36 }
  0xda   : > { %1016 = vmatprep.mubr.msk.f32.mxu0 %vm345_vm12, %v1343_v24 }
  0xdb   : > { %1017 = vmatmul.mubr.msk.f32.gmra.mrb[14].mxu0 %vm344_vm11, %v1343_v24  ;;  %1047 = vmatmul.mubr.msk.f32.gmra.mrb[12].mxu1 %vm374_vm13, %v1343_v24 }
  0xdc   : > { %v308_v38 = vpop.permute.xlu1 %307  ;;  %1048 = vmatprep.mubr.msk.f32.mxu1 %vm377_vm14, %v1343_v24  ;;  %v260_v39 = vpop.permute.xlu0 %259 }
  0xdd   : > { %vm346_vm15 = vcmp.eq.s32.totalorder %v1646_v20, %v260_v39  ;;  %vm347_vm0 = vcmp.eq.s32.totalorder %v1649_v21, %v260_v39  ;;  %vm379_vm2 = vcmp.eq.s32.totalorder %v1649_v21, %v308_v38  ;;  %vm378_vm5 = vcmp.eq.s32.totalorder %v1646_v20, %v308_v38 }
  0xde   : > { %1018 = vmatprep.mubr.msk.f32.mxu0 %vm347_vm0, %v1343_v24 }
  0xdf   : > { %1019 = vmatmul.mubr.msk.f32.gmra.mrb[16].mxu0 %vm346_vm15, %v1343_v24  ;;  %1049 = vmatmul.mubr.msk.f32.gmra.mrb[14].mxu1 %vm376_vm1, %v1343_v24 }
  0xe0   : > { %v311_v40 = vpop.permute.xlu1 %310  ;;  %1050 = vmatprep.mubr.msk.f32.mxu1 %vm379_vm2, %v1343_v24  ;;  %v263_v41 = vpop.permute.xlu0 %262 }
  0xe1   : > { %vm348_vm3 = vcmp.eq.s32.totalorder %v1646_v20, %v263_v41  ;;  %vm349_vm4 = vcmp.eq.s32.totalorder %v1649_v21, %v263_v41  ;;  %vm381_vm6 = vcmp.eq.s32.totalorder %v1649_v21, %v311_v40  ;;  %vm380_vm9 = vcmp.eq.s32.totalorder %v1646_v20, %v311_v40 }
  0xe2   : > { %1020 = vmatprep.mubr.msk.f32.mxu0 %vm349_vm4, %v1343_v24 }
  0xe3   : > { %1021 = vmatmul.mubr.msk.f32.gmra.mrb[18].mxu0 %vm348_vm3, %v1343_v24  ;;  %1051 = vmatmul.mubr.msk.f32.gmra.mrb[16].mxu1 %vm378_vm5, %v1343_v24 }
  0xe4   : > { %v314_v42 = vpop.permute.xlu1 %313  ;;  %1052 = vmatprep.mubr.msk.f32.mxu1 %vm381_vm6, %v1343_v24  ;;  %v266_v43 = vpop.permute.xlu0 %265 }
  0xe5   : > { %vm350_vm7 = vcmp.eq.s32.totalorder %v1646_v20, %v266_v43  ;;  %vm351_vm8 = vcmp.eq.s32.totalorder %v1649_v21, %v266_v43  ;;  %vm383_vm10 = vcmp.eq.s32.totalorder %v1649_v21, %v314_v42  ;;  %vm382_vm13 = vcmp.eq.s32.totalorder %v1646_v20, %v314_v42 }
  0xe6   : > { %1022 = vmatprep.mubr.msk.f32.mxu0 %vm351_vm8, %v1343_v24 }
  0xe7   : > { %1023 = vmatmul.mubr.msk.f32.gmra.mrb[20].mxu0 %vm350_vm7, %v1343_v24  ;;  %1053 = vmatmul.mubr.msk.f32.gmra.mrb[18].mxu1 %vm380_vm9, %v1343_v24 }
  0xe8   : > { %v317_v44 = vpop.permute.xlu1 %316  ;;  %1054 = vmatprep.mubr.msk.f32.mxu1 %vm383_vm10, %v1343_v24  ;;  %v269_v45 = vpop.permute.xlu0 %268 }
  0xe9   : > { %vm352_vm11 = vcmp.eq.s32.totalorder %v1646_v20, %v269_v45  ;;  %vm353_vm12 = vcmp.eq.s32.totalorder %v1649_v21, %v269_v45  ;;  %vm385_vm14 = vcmp.eq.s32.totalorder %v1649_v21, %v317_v44  ;;  %vm384_vm1 = vcmp.eq.s32.totalorder %v1646_v20, %v317_v44 }
  0xea   : > { %1024 = vmatprep.mubr.msk.f32.mxu0 %vm353_vm12, %v1343_v24 }
  0xeb   : > { %1025 = vmatmul.mubr.msk.f32.gmra.mrb[22].mxu0 %vm352_vm11, %v1343_v24  ;;  %1055 = vmatmul.mubr.msk.f32.gmra.mrb[20].mxu1 %vm382_vm13, %v1343_v24 }
  0xec   : > { %v320_v46 = vpop.permute.xlu1 %319  ;;  %1056 = vmatprep.mubr.msk.f32.mxu1 %vm385_vm14, %v1343_v24  ;;  %v272_v47 = vpop.permute.xlu0 %271 }
  0xed   : > { %vm354_vm15 = vcmp.eq.s32.totalorder %v1646_v20, %v272_v47  ;;  %vm355_vm0 = vcmp.eq.s32.totalorder %v1649_v21, %v272_v47  ;;  %vm387_vm2 = vcmp.eq.s32.totalorder %v1649_v21, %v320_v46  ;;  %vm386_vm5 = vcmp.eq.s32.totalorder %v1646_v20, %v320_v46 }
  0xee   : > { %1026 = vmatprep.mubr.msk.f32.mxu0 %vm355_vm0, %v1343_v24  ;;  %vm779_vm0 = vcmask 261120  }
  0xef   : > { %1027 = vmatmul.mubr.msk.f32.gmra.mrb[24].mxu0 %vm354_vm15, %v1343_v24  ;;  %1057 = vmatmul.mubr.msk.f32.gmra.mrb[22].mxu1 %vm384_vm1, %v1343_v24 }
  0xf0   : > { %v323_v48 = vpop.permute.xlu1 %322  ;;  %1058 = vmatprep.mubr.msk.f32.mxu1 %vm387_vm2, %v1343_v24  ;;  %v275_v49 = vpop.permute.xlu0 %274 }
  0xf1   : > { %vm356_vm3 = vcmp.eq.s32.totalorder %v1646_v20, %v275_v49  ;;  %vm357_vm4 = vcmp.eq.s32.totalorder %v1649_v21, %v275_v49  ;;  %vm389_vm6 = vcmp.eq.s32.totalorder %v1649_v21, %v323_v48  ;;  %vm388_vm9 = vcmp.eq.s32.totalorder %v1646_v20, %v323_v48 }
  0xf2   : > { %1028 = vmatprep.mubr.msk.f32.mxu0 %vm357_vm4, %v1343_v24 }
  0xf3   : > { %1029 = vmatmul.mubr.msk.f32.gmra.mrb[26].mxu0 %vm356_vm3, %v1343_v24  ;;  %1059 = vmatmul.mubr.msk.f32.gmra.mrb[24].mxu1 %vm386_vm5, %v1343_v24 }
  0xf4   : > { %v326_v50 = vpop.permute.xlu1 %325  ;;  %1060 = vmatprep.mubr.msk.f32.mxu1 %vm389_vm6, %v1343_v24  ;;  %v278_v51 = vpop.permute.xlu0 %277 }
  0xf5   : > { %vm358_vm7 = vcmp.eq.s32.totalorder %v1646_v20, %v278_v51  ;;  %vm359_vm8 = vcmp.eq.s32.totalorder %v1649_v21, %v278_v51  ;;  %vm391_vm10 = vcmp.eq.s32.totalorder %v1649_v21, %v326_v50  ;;  %vm390_vm13 = vcmp.eq.s32.totalorder %v1646_v20, %v326_v50 }
  0xf6   : > { %1030 = vmatprep.mubr.msk.f32.mxu0 %vm359_vm8, %v1343_v24 }
  0xf7   : > { %1031 = vmatmul.mubr.msk.f32.gmra.mrb[28].mxu0 %vm358_vm7, %v1343_v24  ;;  %1061 = vmatmul.mubr.msk.f32.gmra.mrb[26].mxu1 %vm388_vm9, %v1343_v24 }
  0xf8   : > { %v329_v52 = vpop.permute.xlu1 %328  ;;  %1062 = vmatprep.mubr.msk.f32.mxu1 %vm391_vm10, %v1343_v24  ;;  %v281_v53 = vpop.permute.xlu0 %280 }
  0xf9   : > { %vm360_vm11 = vcmp.eq.s32.totalorder %v1646_v20, %v281_v53  ;;  %vm361_vm12 = vcmp.eq.s32.totalorder %v1649_v21, %v281_v53  ;;  %vm393_vm14 = vcmp.eq.s32.totalorder %v1649_v21, %v329_v52  ;;  %vm392_vm15 = vcmp.eq.s32.totalorder %v1646_v20, %v329_v52 }
  0xfa   : > { %1032 = vmatprep.mubr.msk.f32.mxu0 %vm361_vm12, %v1343_v24 }
  0xfb   : > { %1033 = vmatmul.mubr.msk.f32.gmra.mrb[30].mxu0 %vm360_vm11, %v1343_v24  ;;  %1063 = vmatmul.mubr.msk.f32.gmra.mrb[28].mxu1 %vm390_vm13, %v1343_v24 }
  0xfc   : > { %1064 = vmatprep.mubr.msk.f32.mxu1 %vm393_vm14, %v1343_v24 }
  0xff   : > { %1065 = vmatmul.mubr.msk.f32.gmra.mrb[30].mxu1 %vm392_vm15, %v1343_v24 }
 0x192   : > { %v620_v54 = vpop.f32.mrb[0].mxu0 }
 0x193   : > { %780 = vst.msk [vmem:[%s1781_s15] sm:$0xff] %vm779_vm0, %v620_v54  ;;  %v622_v55 = vpop.f32.mrb[1].mxu0 }
 0x196   : > { %v625_v56 = vpop.f32.mrb[2].mxu0  ;;  %v700_v57 = vpop.f32.mrb[0].mxu1 }
 0x197   : > { %781 = vst.msk [vmem:[%s1781_s15 + $0x8] sm:$0xff] %vm779_vm0, %v625_v56  ;;  %796 = vst.msk [vmem:[%s1781_s15 + $0x80] sm:$0xff] %vm779_vm0, %v700_v57  ;;  %v627_v58 = vpop.f32.mrb[3].mxu0  ;;  %v702_v59 = vpop.f32.mrb[1].mxu1 }
 0x19a   : > { %v630_v60 = vpop.f32.mrb[4].mxu0  ;;  %v705_v61 = vpop.f32.mrb[2].mxu1 }
 0x19b   : > { %782 = vst.msk [vmem:[%s1781_s15 + $0x10] sm:$0xff] %vm779_vm0, %v630_v60  ;;  %797 = vst.msk [vmem:[%s1781_s15 + $0x88] sm:$0xff] %vm779_vm0, %v705_v61  ;;  %v632_v62 = vpop.f32.mrb[5].mxu0  ;;  %v707_v63 = vpop.f32.mrb[3].mxu1 }
 0x19e   : > { %v635_v0 = vpop.f32.mrb[6].mxu0  ;;  %v710_v2 = vpop.f32.mrb[4].mxu1 }
 0x19f   : > { %783 = vst.msk [vmem:[%s1781_s15 + $0x18] sm:$0xff] %vm779_vm0, %v635_v0  ;;  %798 = vst.msk [vmem:[%s1781_s15 + $0x90] sm:$0xff] %vm779_vm0, %v710_v2  ;;  %v637_v3 = vpop.f32.mrb[7].mxu0  ;;  %v712_v4 = vpop.f32.mrb[5].mxu1 }
 0x1a2   : > { %v640_v5 = vpop.f32.mrb[8].mxu0  ;;  %v715_v6 = vpop.f32.mrb[6].mxu1 }
 0x1a3   : > { %784 = vst.msk [vmem:[%s1781_s15 + $0x20] sm:$0xff] %vm779_vm0, %v640_v5  ;;  %799 = vst.msk [vmem:[%s1781_s15 + $0x98] sm:$0xff] %vm779_vm0, %v715_v6  ;;  %v642_v7 = vpop.f32.mrb[9].mxu0  ;;  %v717_v8 = vpop.f32.mrb[7].mxu1 }
 0x1a6   : > { %v645_v9 = vpop.f32.mrb[10].mxu0  ;;  %v720_v10 = vpop.f32.mrb[8].mxu1 }
 0x1a7   : > { %785 = vst.msk [vmem:[%s1781_s15 + $0x28] sm:$0xff] %vm779_vm0, %v645_v9  ;;  %800 = vst.msk [vmem:[%s1781_s15 + $0xa0] sm:$0xff] %vm779_vm0, %v720_v10  ;;  %v647_v11 = vpop.f32.mrb[11].mxu0  ;;  %v722_v12 = vpop.f32.mrb[9].mxu1 }
 0x1aa   : > { %v650_v13 = vpop.f32.mrb[12].mxu0  ;;  %v725_v14 = vpop.f32.mrb[10].mxu1 }
 0x1ab   : > { %786 = vst.msk [vmem:[%s1781_s15 + $0x30] sm:$0xff] %vm779_vm0, %v650_v13  ;;  %801 = vst.msk [vmem:[%s1781_s15 + $0xa8] sm:$0xff] %vm779_vm0, %v725_v14  ;;  %v652_v15 = vpop.f32.mrb[13].mxu0  ;;  %v727_v16 = vpop.f32.mrb[11].mxu1 }
 0x1ae   : > { %v655_v17 = vpop.f32.mrb[14].mxu0  ;;  %v730_v18 = vpop.f32.mrb[12].mxu1 }
 0x1af   : > { %787 = vst.msk [vmem:[%s1781_s15 + $0x38] sm:$0xff] %vm779_vm0, %v655_v17  ;;  %802 = vst.msk [vmem:[%s1781_s15 + $0xb0] sm:$0xff] %vm779_vm0, %v730_v18  ;;  %v657_v19 = vpop.f32.mrb[15].mxu0  ;;  %v732_v20 = vpop.f32.mrb[13].mxu1 }
 0x1b2   : > { %v660_v21 = vpop.f32.mrb[16].mxu0  ;;  %v735_v22 = vpop.f32.mrb[14].mxu1 }
 0x1b3   : > { %788 = vst.msk [vmem:[%s1781_s15 + $0x40] sm:$0xff] %vm779_vm0, %v660_v21  ;;  %803 = vst.msk [vmem:[%s1781_s15 + $0xb8] sm:$0xff] %vm779_vm0, %v735_v22  ;;  %v662_v23 = vpop.f32.mrb[17].mxu0  ;;  %v737_v24 = vpop.f32.mrb[15].mxu1 }
 0x1b6   : > { %v665_v1 = vpop.f32.mrb[18].mxu0  ;;  %v740_v25 = vpop.f32.mrb[16].mxu1 }
 0x1b7   : > { %789 = vst.msk [vmem:[%s1781_s15 + $0x48] sm:$0xff] %vm779_vm0, %v665_v1  ;;  %804 = vst.msk [vmem:[%s1781_s15 + $0xc0] sm:$0xff] %vm779_vm0, %v740_v25  ;;  %v667_v26 = vpop.f32.mrb[19].mxu0  ;;  %v742_v27 = vpop.f32.mrb[17].mxu1 }
 0x1ba   : > { %v670_v28 = vpop.f32.mrb[20].mxu0  ;;  %v745_v29 = vpop.f32.mrb[18].mxu1 }
 0x1bb   : > { %790 = vst.msk [vmem:[%s1781_s15 + $0x50] sm:$0xff] %vm779_vm0, %v670_v28  ;;  %805 = vst.msk [vmem:[%s1781_s15 + $0xc8] sm:$0xff] %vm779_vm0, %v745_v29  ;;  %v672_v30 = vpop.f32.mrb[21].mxu0  ;;  %v747_v31 = vpop.f32.mrb[19].mxu1 }
 0x1be   : > { %v675_v32 = vpop.f32.mrb[22].mxu0  ;;  %v750_v33 = vpop.f32.mrb[20].mxu1 }
 0x1bf   : > { %791 = vst.msk [vmem:[%s1781_s15 + $0x58] sm:$0xff] %vm779_vm0, %v675_v32  ;;  %806 = vst.msk [vmem:[%s1781_s15 + $0xd0] sm:$0xff] %vm779_vm0, %v750_v33  ;;  %v677_v34 = vpop.f32.mrb[23].mxu0  ;;  %v752_v35 = vpop.f32.mrb[21].mxu1 }
 0x1c2   : > { %v680_v36 = vpop.f32.mrb[24].mxu0  ;;  %v755_v37 = vpop.f32.mrb[22].mxu1 }
 0x1c3   : > { %792 = vst.msk [vmem:[%s1781_s15 + $0x60] sm:$0xff] %vm779_vm0, %v680_v36  ;;  %807 = vst.msk [vmem:[%s1781_s15 + $0xd8] sm:$0xff] %vm779_vm0, %v755_v37  ;;  %v682_v38 = vpop.f32.mrb[25].mxu0  ;;  %v757_v39 = vpop.f32.mrb[23].mxu1 }
 0x1c6   : > { %v685_v40 = vpop.f32.mrb[26].mxu0  ;;  %v760_v41 = vpop.f32.mrb[24].mxu1 }
 0x1c7   : > { %793 = vst.msk [vmem:[%s1781_s15 + $0x68] sm:$0xff] %vm779_vm0, %v685_v40  ;;  %808 = vst.msk [vmem:[%s1781_s15 + $0xe0] sm:$0xff] %vm779_vm0, %v760_v41  ;;  %v687_v42 = vpop.f32.mrb[27].mxu0  ;;  %v762_v43 = vpop.f32.mrb[25].mxu1 }
 0x1ca   : > { %v690_v44 = vpop.f32.mrb[28].mxu0  ;;  %v765_v45 = vpop.f32.mrb[26].mxu1 }
 0x1cb   : > { %794 = vst.msk [vmem:[%s1781_s15 + $0x70] sm:$0xff] %vm779_vm0, %v690_v44  ;;  %809 = vst.msk [vmem:[%s1781_s15 + $0xe8] sm:$0xff] %vm779_vm0, %v765_v45  ;;  %v692_v46 = vpop.f32.mrb[29].mxu0  ;;  %v767_v47 = vpop.f32.mrb[27].mxu1 }
 0x1ce   : > { %v695_v48 = vpop.f32.mrb[30].mxu0  ;;  %v770_v49 = vpop.f32.mrb[28].mxu1 }
 0x1cf   : > { %795 = vst.msk [vmem:[%s1781_s15 + $0x78] sm:$0xff] %vm779_vm0, %v695_v48  ;;  %810 = vst.msk [vmem:[%s1781_s15 + $0xf0] sm:$0xff] %vm779_vm0, %v770_v49  ;;  %v697_v50 = vpop.f32.mrb[31].mxu0  ;;  %v772_v51 = vpop.f32.mrb[29].mxu1 }
 0x1d2   : > { %v775_v52 = vpop.f32.mrb[30].mxu1 }
 0x1d3   : > { %811 = vst.msk [vmem:[%s1781_s15 + $0xf8] sm:$0xff] %vm779_vm0, %v775_v52  ;;  %v777_v53 = vpop.f32.mrb[31].mxu1 }
 0x1d4   : > { %1267 = shalt.err (!%p1264_p5)
}
 0x1d5   : > { %s1268_s28 = scalar_lea.hbm %s1850_s19, 4096  ;;  %s1272_s30 = scalar_lea.hbm %s1905_s2, 8192 }
 0x1d6   : > { %p1269_p4 = scmp.ne.s32.totalorder %s1850_s19, %s1268_s28  ;;  %p1273_p12 = scmp.lt.u32.totalorder %s1850_s19, %s1905_s2 }
 0x1d7   : > { %p1274_p1 = scmp.lt.u32.totalorder %s1272_s30, %s1268_s28  ;;  %p1276_p8 = scmp.lt.u32.totalorder %s1268_s28, %s1850_s19 }
 0x1d8   : > { %p1270_p7 = pnand %p1269_p4, %p1913_p9 }
 0x1d9   : > { %p1275_p3 = por %p1274_p1, %p1273_p12 }
 0x1da   : > { %p1271_p10 = pneg %p1270_p7 }
 0x1db   : > { %p1277_p11 = por %p1276_p8, %p1275_p3 }
 0x1dd   : > { %p1278_p0 = pnand %p1277_p11, %p1271_p10 }
 0x1df   : > { %1281 = shalt.err (!%p1278_p0)
}
 0x1e0   : > { %s1345_s6 = smov 128   ;;  %s1346_s15 = smov 8  }
 0x1e1   : > { %1155 = dma.vmem_to_hbm [thread:$0]  (%p1913_p9), %s1852_s21, 4096, %s1850_s19, %s813_s12, %s1345_s6, %s1345_s6, %s1346_s15  }
 0x1e2 PF: > { %s843_s7 = sand.u32 1, %s1316_s9   ;;  %p1914_p6 = scmp.ne.s32.totalorder %s1910_s24, 0 }
 0x1e3   : > { %p1915_p13 = scmp.ge.s32.totalorder %s1336_s14, 2  ;;  %s844_s16 = scalar_lea.sflag [#allocation4], %s843_s7 }
 0x1e5   : > { %p1162_p2 = pnand %p1915_p13, %p1914_p6 }
 0x1e7   : > { %1311 = dma.done.wait (!%p1162_p2), %s844_s16, 4096  }
 0x1e8   : > { %1313 = vsyncadd (!%p1162_p2), %s844_s16, 4294963200  ;;  %s18_s14 = sadd.s32 1, %s1336_s14   ;;  %s1916_s9 = smov %s1320_s10 }
 0x1e9   : > { %p15_p5 = scmp.ge.s32.totalorder %s18_s14, 4   ;;  %s1917_s10 = smov %s1324_s11 }
 0x1ea   : > { %s1918_s11 = smov %s1418_s23  ;;  %s1919_s12 = smov %s1332_s13 }
 0x1eb   : > { %s1920_s13 = smov %s1922_s17  ;;  %17 = sbr.rel (!%p15_p5) target bundleno = 6 (0x6), region = 76 }
 0x1f2   :  { %849 = vsyncpa [#allocation3], 1 }
 0x1f3   :  { %851 = vsyncpa [#allocation3 + $0x1], 1 }
 0x1f4   :  { %852 = vsyncpa [#allocation4], 1 }
 0x1f5   :  { %854 = vsyncpa [#allocation4 + $0x1], 1 }

</bundles_post_ra>
